<compile_context>
chip_gen: v7x
topology: tpu7x:2x2x1
jax: 0.10.0
libtpu: 0.0.40
codegen_flags: <defaults>
</compile_context>

<pallas_src>
import functools

import jax
import jax.numpy as jnp
from jax.experimental import pallas as pl
from jax.experimental.pallas import tpu as pltpu

ALPHA = 0.7
BETA = 0.3
GAMMA = 1.33
SMOOTH = 0.0
EPS = 1e-7


def _tversky_sums_kernel(x_ref, t_ref, tp_ref, sp_ref, st_ref, *,
                         hw, tile_hw, need_mask):
    """Grid axis 0 walks lane tiles of the flattened spatial dim (H*W).

    Accumulates, per (batch, class) row:
        tp  = sum(sigmoid(x) * t)
        sp  = sum(sigmoid(x))
        st  = sum(t)
    directly into the VMEM-resident outputs (same output block for every
    grid step). fp / fn / score / focal power are finalized outside.
    """
    k = pl.program_id(0)

    @pl.when(k == 0)
    def _():
        tp_ref[...] = jnp.zeros_like(tp_ref)
        sp_ref[...] = jnp.zeros_like(sp_ref)
        st_ref[...] = jnp.zeros_like(st_ref)

    x = x_ref[...].astype(jnp.float32)          # (NC, tile_hw)
    t = t_ref[...].astype(jnp.float32)          # (NC, tile_hw)
    p = jax.nn.sigmoid(x)                       # == logsigmoid(x).exp()

    if need_mask:
        # Zero out-of-bounds lanes of the (possibly padded) last tile.
        lane = jax.lax.broadcasted_iota(jnp.int32, x.shape, 1) + k * tile_hw
        valid = lane < hw
        p = jnp.where(valid, p, 0.0)
        t = jnp.where(valid, t, 0.0)

    tp_ref[...] += jnp.sum(p * t, axis=1, keepdims=True)   # (NC, 1)
    sp_ref[...] += jnp.sum(p, axis=1, keepdims=True)        # (NC, 1)
    st_ref[...] += jnp.sum(t, axis=1, keepdims=True)        # (NC, 1)


def focal_tversky_loss(logits, targets, *, target_block_bytes=4 * 1024 * 1024):
    """logits, targets: (N, C, H, W) arrays (PyTorch NCHW convention)."""
    N, C, H, W = logits.shape
    NC = N * C
    HW = H * W

    # Free contiguous reshapes — no transpose, no extra HBM pass.
    x = logits.reshape(NC, HW)
    t = targets.reshape(NC, HW)

    # Lane tile: multiple of 128, large enough to amortize per-step overhead,
    # small enough that (2 inputs x 2 pipeline buffers x block) fits scoped
    # VMEM on every generation (v7x has 64 MiB total).
    bytes_per_row = NC * 4  # f32 accumulation path (conservative sizing)
    max_lanes = max(128, (target_block_bytes // bytes_per_row) // 128 * 128)
    hw_padded = pl.cdiv(HW, 128) * 128
    tile_hw = int(min(max_lanes, hw_padded))
    num_tiles = pl.cdiv(HW, tile_hw)
    need_mask = (HW % tile_hw) != 0

    kernel = functools.partial(
        _tversky_sums_kernel, hw=HW, tile_hw=tile_hw, need_mask=need_mask)

    acc_shape = jax.ShapeDtypeStruct((NC, 1), jnp.float32)
    acc_spec = pl.BlockSpec((NC, 1), lambda k: (0, 0))

    tp, sp, st = pl.pallas_call(
        kernel,
        out_shape=(acc_shape, acc_shape, acc_shape),
        grid_spec=pltpu.PrefetchScalarGridSpec(
            num_scalar_prefetch=0,
            grid=(num_tiles,),
            in_specs=[
                pl.BlockSpec((NC, tile_hw), lambda k: (0, k)),
                pl.BlockSpec((NC, tile_hw), lambda k: (0, k)),
            ],
            out_specs=(acc_spec, acc_spec, acc_spec),
        ),
        compiler_params=pltpu.CompilerParams(
            dimension_semantics=("arbitrary",),   # reduction axis
            vmem_limit_bytes=48 * 1024 * 1024,
        ),
    )(x, t)

    # Tiny per-class finalize in plain JAX (O(N*C) work).
    tp = tp.reshape(N, C).sum(axis=0)
    sp = sp.reshape(N, C).sum(axis=0)
    st = st.reshape(N, C).sum(axis=0)
    fp = sp - tp                                   # sum(p*(1-t))
    fn = st - tp                                   # sum((1-p)*t)
    denom = jnp.maximum(tp + ALPHA * fp + BETA * fn + SMOOTH, EPS)
    score = (tp + SMOOTH) / denom
    loss = (1.0 - score) * (st > 0).astype(jnp.float32)   # smp class masking
    return jnp.mean(loss) ** GAMMA


def _reference(logits, targets):
    """Pure-JAX reference of smp TverskyLoss (multilabel, from_logits)."""
    N, C, H, W = logits.shape
    p = jax.nn.sigmoid(logits.astype(jnp.float32)).reshape(N, C, -1)
    t = targets.astype(jnp.float32).reshape(N, C, -1)
    dims = (0, 2)
    tp = jnp.sum(p * t, axis=dims)
    fp = jnp.sum(p * (1.0 - t), axis=dims)
    fn = jnp.sum((1.0 - p) * t, axis=dims)
    score = (tp + SMOOTH) / jnp.maximum(tp + ALPHA * fp + BETA * fn + SMOOTH, EPS)
    loss = (1.0 - score) * (jnp.sum(t, axis=dims) > 0).astype(jnp.float32)
    return jnp.mean(loss) ** GAMMA


if __name__ == "__main__":
    key = jax.random.PRNGKey(0)
    k1, k2 = jax.random.split(key)
    N, C, H, W = 2, 4, 16, 16
    logits = jax.random.normal(k1, (N, C, H, W), dtype=jnp.float32)
    targets = (jax.random.uniform(k2, (N, C, H, W)) > 0.5).astype(jnp.float32)

    out = focal_tversky_loss(logits, targets)
    out = jax.block_until_ready(out)

    ref = _reference(logits, targets)
    assert jnp.allclose(out, ref, rtol=1e-4, atol=1e-6), (out, ref)
    print("KERNEL_OK")
</pallas_src>

<mosaic_0001>
module attributes {stable_mosaic.version = 11 : i64} {
  func.func @_tversky_sums_kernel(%arg0: i32, %arg1: memref<8x256xf32, #tpu.memory_space<vmem>>, %arg2: memref<8x256xf32, #tpu.memory_space<vmem>>, %arg3: memref<8x1xf32, #tpu.memory_space<vmem>>, %arg4: memref<8x1xf32, #tpu.memory_space<vmem>>, %arg5: memref<8x1xf32, #tpu.memory_space<vmem>>) attributes {dimension_semantics = [#tpu.dimension_semantics<arbitrary>], iteration_bounds = array<i64: 1>, scalar_prefetch = 0 : i64, scratch_operands = 0 : i64, tpu.core_type = #tpu.core_type<tc>, window_params = [{transform_indices = @transform_0, window_bounds = array<i64: 8, 256>}, {transform_indices = @transform_1, window_bounds = array<i64: 8, 256>}, {pipeline_mode = #tpu.pipeline_mode<synchronous>, transform_indices = @transform_2, window_bounds = array<i64: 8, 1>}, {pipeline_mode = #tpu.pipeline_mode<synchronous>, transform_indices = @transform_3, window_bounds = array<i64: 8, 1>}, {pipeline_mode = #tpu.pipeline_mode<synchronous>, transform_indices = @transform_4, window_bounds = array<i64: 8, 1>}]} {
    %c0_i32 = arith.constant 0 : i32
    %0 = arith.cmpi eq, %arg0, %c0_i32 : i32
    %1 = arith.extui %0 : i1 to i32
    %c0_i32_0 = arith.constant 0 : i32
    %2 = arith.cmpi ne, %1, %c0_i32_0 : i32
    scf.if %2 {
      %cst_19 = arith.constant 0.000000e+00 : f32
      %26 = vector.broadcast %cst_19 : f32 to vector<8x1xf32>
      %c0_20 = arith.constant 0 : index
      %c0_21 = arith.constant 0 : index
      %27 = vector.load %arg3[%c0_20, %c0_21] : memref<8x1xf32, #tpu.memory_space<vmem>>, vector<8x1xf32>
      tpu.vector_store %arg3[%c0_20, %c0_21], %26 {strides = array<i32>} : memref<8x1xf32, #tpu.memory_space<vmem>>, vector<8x1xf32>,
      %cst_22 = arith.constant 0.000000e+00 : f32
      %28 = vector.broadcast %cst_22 : f32 to vector<8x1xf32>
      %c0_23 = arith.constant 0 : index
      %c0_24 = arith.constant 0 : index
      %29 = vector.load %arg4[%c0_23, %c0_24] : memref<8x1xf32, #tpu.memory_space<vmem>>, vector<8x1xf32>
      tpu.vector_store %arg4[%c0_23, %c0_24], %28 {strides = array<i32>} : memref<8x1xf32, #tpu.memory_space<vmem>>, vector<8x1xf32>,
      %cst_25 = arith.constant 0.000000e+00 : f32
      %30 = vector.broadcast %cst_25 : f32 to vector<8x1xf32>
      %c0_26 = arith.constant 0 : index
      %c0_27 = arith.constant 0 : index
      %31 = vector.load %arg5[%c0_26, %c0_27] : memref<8x1xf32, #tpu.memory_space<vmem>>, vector<8x1xf32>
      tpu.vector_store %arg5[%c0_26, %c0_27], %30 {strides = array<i32>} : memref<8x1xf32, #tpu.memory_space<vmem>>, vector<8x1xf32>,
    } else {
    }
    %c0 = arith.constant 0 : index
    %c0_1 = arith.constant 0 : index
    %3 = vector.load %arg1[%c0, %c0_1] : memref<8x256xf32, #tpu.memory_space<vmem>>, vector<8x256xf32>
    %c0_2 = arith.constant 0 : index
    %c0_3 = arith.constant 0 : index
    %4 = vector.load %arg2[%c0_2, %c0_3] : memref<8x256xf32, #tpu.memory_space<vmem>>, vector<8x256xf32>
    %5 = arith.negf %3 : vector<8x256xf32>
    %6 = math.exp %5 : vector<8x256xf32>
    %cst = arith.constant 1.000000e+00 : f32
    %7 = vector.broadcast %cst : f32 to vector<8x256xf32>
    %8 = arith.addf %7, %6 : vector<8x256xf32>
    %9 = arith.divf %7, %8 : vector<8x256xf32>
    %c0_4 = arith.constant 0 : index
    %c0_5 = arith.constant 0 : index
    %10 = vector.load %arg3[%c0_4, %c0_5] : memref<8x1xf32, #tpu.memory_space<vmem>>, vector<8x1xf32>
    %11 = arith.mulf %9, %4 : vector<8x256xf32>
    %cst_6 = arith.constant dense<0.000000e+00> : vector<8xf32>
    %12 = vector.multi_reduction <add>, %11, %cst_6 [1] : vector<8x256xf32> to vector<8xf32>
    %13 = vector.shape_cast %12 : vector<8xf32> to vector<8x1xf32>
    %14 = arith.addf %10, %13 : vector<8x1xf32>
    %c0_7 = arith.constant 0 : index
    %c0_8 = arith.constant 0 : index
    %15 = vector.load %arg3[%c0_7, %c0_8] : memref<8x1xf32, #tpu.memory_space<vmem>>, vector<8x1xf32>
    tpu.vector_store %arg3[%c0_7, %c0_8], %14 {strides = array<i32>} : memref<8x1xf32, #tpu.memory_space<vmem>>, vector<8x1xf32>,
    %c0_9 = arith.constant 0 : index
    %c0_10 = arith.constant 0 : index
    %16 = vector.load %arg4[%c0_9, %c0_10] : memref<8x1xf32, #tpu.memory_space<vmem>>, vector<8x1xf32>
    %cst_11 = arith.constant dense<0.000000e+00> : vector<8xf32>
    %17 = vector.multi_reduction <add>, %9, %cst_11 [1] : vector<8x256xf32> to vector<8xf32>
    %18 = vector.shape_cast %17 : vector<8xf32> to vector<8x1xf32>
    %19 = arith.addf %16, %18 : vector<8x1xf32>
    %c0_12 = arith.constant 0 : index
    %c0_13 = arith.constant 0 : index
    %20 = vector.load %arg4[%c0_12, %c0_13] : memref<8x1xf32, #tpu.memory_space<vmem>>, vector<8x1xf32>
    tpu.vector_store %arg4[%c0_12, %c0_13], %19 {strides = array<i32>} : memref<8x1xf32, #tpu.memory_space<vmem>>, vector<8x1xf32>,
    %c0_14 = arith.constant 0 : index
    %c0_15 = arith.constant 0 : index
    %21 = vector.load %arg5[%c0_14, %c0_15] : memref<8x1xf32, #tpu.memory_space<vmem>>, vector<8x1xf32>
    %cst_16 = arith.constant dense<0.000000e+00> : vector<8xf32>
    %22 = vector.multi_reduction <add>, %4, %cst_16 [1] : vector<8x256xf32> to vector<8xf32>
    %23 = vector.shape_cast %22 : vector<8xf32> to vector<8x1xf32>
    %24 = arith.addf %21, %23 : vector<8x1xf32>
    %c0_17 = arith.constant 0 : index
    %c0_18 = arith.constant 0 : index
    %25 = vector.load %arg5[%c0_17, %c0_18] : memref<8x1xf32, #tpu.memory_space<vmem>>, vector<8x1xf32>
    tpu.vector_store %arg5[%c0_17, %c0_18], %24 {strides = array<i32>} : memref<8x1xf32, #tpu.memory_space<vmem>>, vector<8x1xf32>,
    return
  }
  func.func @transform_0(%arg0: i32) -> (i32, i32) {
    %c0_i32 = arith.constant 0 : i32
    %c0_i32_0 = arith.constant 0 : i32
    return %c0_i32, %arg0 : i32, i32
  }
  func.func @transform_1(%arg0: i32) -> (i32, i32) {
    %c0_i32 = arith.constant 0 : i32
    %c0_i32_0 = arith.constant 0 : i32
    return %c0_i32, %arg0 : i32, i32
  }
  func.func @transform_2(%arg0: i32) -> (i32, i32) {
    %c0_i32 = arith.constant 0 : i32
    %c0_i32_0 = arith.constant 0 : i32
    %c0_i32_1 = arith.constant 0 : i32
    return %c0_i32, %c0_i32_0 : i32, i32
  }
  func.func @transform_3(%arg0: i32) -> (i32, i32) {
    %c0_i32 = arith.constant 0 : i32
    %c0_i32_0 = arith.constant 0 : i32
    %c0_i32_1 = arith.constant 0 : i32
    return %c0_i32, %c0_i32_0 : i32, i32
  }
  func.func @transform_4(%arg0: i32) -> (i32, i32) {
    %c0_i32 = arith.constant 0 : i32
    %c0_i32_0 = arith.constant 0 : i32
    %c0_i32_1 = arith.constant 0 : i32
    return %c0_i32, %c0_i32_0 : i32, i32
  }
}

</mosaic_0001>

<bundles_post_ra>
// kernel: tpu_custom_call.1
= control target key start
LH: loop header
LB: loop body
LE: loop exit
PB: predicated region body
PF: predicated region fallthrough
CT: control target
= control target key end

     0   :  { %10 = vsyncpa [#allocation3], 0  ;;  %s243_s0 = inlined_call_operand.hbm [shape: f32[8,256], index: 0, kind: input, shape index: {}]   ;;  %s244_s1 = inlined_call_operand.hbm [shape: f32[8,256], index: 1, kind: input, shape index: {}]   ;;  %s245_s2 = inlined_call_operand.vmem [shape: f32[8,1], index: 2, kind: output, shape index: {0}]   ;;  %s246_s3 = inlined_call_operand.vmem [shape: f32[8,1], index: 3, kind: output, shape index: {1}]   ;;  %s247_s4 = inlined_call_operand.vmem [shape: f32[8,1], index: 4, kind: output, shape index: {2}]  }
   0x1   :  { %11 = vsyncpa [#allocation5], 0  ;;  %s158_s15 = smov [#allocation2]   ;;  %s159_s17 = smov [#allocation4]  }
   0x2   :  { %s18_s16 = sshll.u32 %s158_s15, 4  ;;  %s28_s18 = sshll.u32 %s159_s17, 4  ;;  %s19_s16 = int_to_ptr.vmem [resolvable:$true] %s18_s16  ;;  %s29_s18 = int_to_ptr.vmem [resolvable:$true] %s28_s18 }
   0x3   :  { %s110_s21 = scalar_lea.hbm %s243_s0, 256 }
   0x4   :  { %p111_p0 = scmp.ne.s32.totalorder %s243_s0, %s110_s21  ;;  %p114_p1 = scmp.lt.u32.totalorder %s110_s21, %s243_s0 }
   0x6   :  { %p116_p2 = pnand %p114_p1, %p111_p0 }
   0x8   :  { %119 = shalt.err (!%p116_p2)
}
   0x9   :  { %s120_s26 = scalar_lea.vmem %s19_s16, 256  ;;  %p125_p4 = scmp.lt.s32.totalorder %s19_s16, %s19_s16 }
   0xa   :  { %p121_p3 = scmp.ne.s32.totalorder %s19_s16, %s120_s26  ;;  %p126_p5 = scmp.lt.s32.totalorder %s120_s26, %s120_s26 }
   0xc   :  { %p127_p6 = por %p126_p5, %p125_p4 }
   0xe   :  { %p128_p7 = pnand %p127_p6, %p121_p3 }
  0x10   :  { %131 = shalt.err (!%p128_p7)
}
  0x11   :  { %21 = dma.hbm_to_vmem [thread:$0]  %s243_s0, 256, %s19_s16, [#allocation3]  }
  0x12   :  { %s132_s5 = scalar_lea.hbm %s244_s1, 256 }
  0x13   :  { %p133_p8 = scmp.ne.s32.totalorder %s244_s1, %s132_s5  ;;  %p136_p9 = scmp.lt.u32.totalorder %s132_s5, %s244_s1 }
  0x15   :  { %p138_p10 = pnand %p136_p9, %p133_p8 }
  0x17   :  { %141 = shalt.err (!%p138_p10)
}
  0x18   :  { %s142_s10 = scalar_lea.vmem %s29_s18, 256  ;;  %p147_p12 = scmp.lt.s32.totalorder %s29_s18, %s29_s18 }
  0x19   :  { %p143_p11 = scmp.ne.s32.totalorder %s29_s18, %s142_s10  ;;  %p148_p13 = scmp.lt.s32.totalorder %s142_s10, %s142_s10 }
  0x1b   :  { %p149_p0 = por %p148_p13, %p147_p12 }
  0x1d   :  { %p150_p1 = pnand %p149_p0, %p143_p11 }
  0x1f   :  { %153 = shalt.err (!%p150_p1)
}
  0x20   :  { %31 = dma.hbm_to_vmem [thread:$0]  %s244_s1, 256, %s29_s18, [#allocation5]  }
  0x21   :  { %154 = dma.done.wait [#allocation3], 256  }
  0x22   :  { %155 = vsyncadd [#allocation3], 4294967040 }
  0x23   :  { %156 = dma.done.wait [#allocation5], 256  }
  0x24   :  { %157 = vsyncadd [#allocation5], 4294967040  ;;  %vm42_vm0 = vcmask 7168   ;;  %v160_v0 = vmov 0.0   ;;  %v46_v1 = vld [vmem:[#allocation2] sm:$0xff]  ;;  %v47_v2 = vld [vmem:[#allocation2 + $0x8] sm:$0xff] }
  0x25   :  { %43 = vst.msk [vmem:[%s245_s2] sm:$0xff] %vm42_vm0, %v160_v0  ;;  %44 = vst.msk [vmem:[%s246_s3] sm:$0xff] %vm42_vm0, %v160_v0  ;;  %v48_v3 = vld [vmem:[#allocation4] sm:$0xff]  ;;  %v49_v4 = vld [vmem:[#allocation4 + $0x8] sm:$0xff]  ;;  %v97_v5 = vmul.f32 -1.442695, %v46_v1 }
  0x26   :  { %45 = vst.msk [vmem:[%s247_s4] sm:$0xff] %vm42_vm0, %v160_v0  ;;  %v98_v6 = vmul.f32 -1.442695, %v47_v2  ;;  %v78_v7 = vadd.f32 %v49_v4, %v48_v3 }
  0x27   :  { %102 = vpow2.f32 %v97_v5 }
  0x28   :  { %104 = vpow2.f32 %v98_v6  ;;  %79 = vadd.xlane.f32.xlu1 %v78_v7 }
  0x2c   :  { %v62_v21 = vld [vmem:[%s245_s2] sm:$0xff] }
  0x2d   :  { %v77_v18 = vld [vmem:[%s247_s4] sm:$0xff] }
  0x2e   :  { %v71_v24 = vld [vmem:[%s246_s3] sm:$0xff] }
  0x31   :  { %v103_v8 = vpop.eup %102 }
  0x32   :  { %v105_v9 = vpop.eup %104  ;;  %v56_v10 = vadd.f32 1.0, %v103_v8 }
  0x33   :  { %v57_v11 = vadd.f32 1.0, %v105_v9 }
  0x34   :  { %106 = vrcp.f32 %v56_v10 }
  0x35   :  { %108 = vrcp.f32 %v57_v11 }
  0x3e   :  { %v107_v12 = vpop.eup %106 }
  0x3f   :  { %v109_v13 = vpop.eup %108  ;;  %v63_v14 = vmul.f32 %v107_v12, %v48_v3 }
  0x40   :  { %v64_v15 = vmul.f32 %v109_v13, %v49_v4  ;;  %v72_v17 = vadd.f32 %v109_v13, %v107_v12 }
  0x42   :  { %v65_v16 = vadd.f32 %v64_v15, %v63_v14 }
  0x44   :  { %66 = vadd.xlane.f32.xlu0 %v65_v16 }
  0x48   :  { %73 = vadd.xlane.f32.xlu0 %v72_v17 }
  0xb5   :  { %v80_v19 = vpop.xlane.xlu1 %79 }
  0xb6   :  { %v81_v20 = vadd.f32 %v80_v19, %v77_v18 }
  0xb8   :  { %82 = vst.msk [vmem:[%s247_s4] sm:$0xff] %vm42_vm0, %v81_v20 }
  0xd1   :  { %v67_v22 = vpop.xlane.xlu0 %66 }
  0xd2   :  { %v68_v23 = vadd.f32 %v67_v22, %v62_v21 }
  0xd4   :  { %70 = vst.msk [vmem:[%s245_s2] sm:$0xff] %vm42_vm0, %v68_v23 }
  0xd5   :  { %v74_v25 = vpop.xlane.xlu0 %73 }
  0xd6   :  { %v75_v26 = vadd.f32 %v74_v25, %v71_v24 }
  0xd8   :  { %76 = vst.msk [vmem:[%s246_s3] sm:$0xff] %vm42_vm0, %v75_v26 }
  0xd9   :  { %95 = vsyncpa [#allocation3], 1 }
  0xda   :  { %96 = vsyncpa [#allocation5], 1 }

</bundles_post_ra>
